<compile_context>
chip_gen: v7x
topology: tpu7x:2x2x1
jax: 0.10.0
libtpu: 0.0.40
codegen_flags: <defaults>
</compile_context>

<pallas_src>
import jax
import jax.numpy as jnp
from jax.experimental import pallas as pl
from jax.experimental.pallas import tpu as pltpu


def state_critic_kernel(xs_ref, xd_ref, wsf_ref, wdf_ref, bf_ref,
                        w2_ref, b2_ref, w3t_ref, b3s_ref, out_ref):
    xs = xs_ref[...]                        # (TM, Cs)   TM = tile_b * S
    xd = xd_ref[...]                        # (TM, Cd)
    wsf = wsf_ref[...]                      # (Cs, 20)   encoder folded into fc1
    wdf = wdf_ref[...]                      # (Cd, 20)

    tile_b = out_ref.shape[0]
    tm = xs.shape[0]
    seq = tm // tile_b
    h1 = wsf.shape[1]

    # Fused encoder + fc1: tiny-K contraction as unrolled rank-1 VPU updates
    # (K=2..3 would waste an entire MXU push).  Bias folded in as the init term.
    h = xs[:, 0:1] * wsf[0:1, :] + bf_ref[...]            # (TM, 20)
    for k in range(1, xs.shape[1]):
        h = h + xs[:, k:k + 1] * wsf[k:k + 1, :]
    for k in range(xd.shape[1]):
        h = h + xd[:, k:k + 1] * wdf[k:k + 1, :]
    h = jnp.maximum(h, 0.0)                                # relu(fc1)

    o = jnp.dot(h, w2_ref[...],
                preferred_element_type=jnp.float32) + b2_ref[...]
    o = jnp.maximum(o, 0.0)                                # relu(fc2)

    # fc3 is linear -> sum over the sequence first, then project with w3.
    r = jnp.sum(o.reshape(tile_b, seq, h1), axis=1)        # (tile_b, 20)
    out_ref[...] = (jnp.sum(r * w3t_ref[...], axis=-1, keepdims=True)
                    + b3s_ref[...])                        # (tile_b, 1)


def _choose_tile_b(B, S, max_rows=2048):
    """Batches per grid step: divisor of B, rows<=max_rows, sublane-aligned."""
    cap = max(1, max_rows // max(S, 1))
    if B <= cap:
        return B                           # single (or whole-array) block
    tile_b = (cap // 8) * 8                # keep (tile_b, 1) output block aligned
    while tile_b >= 8 and B % tile_b != 0:
        tile_b -= 8
    return tile_b if tile_b >= 8 else B


def state_critic(static, dynamic, params, *, max_tile_rows=2048):
    """static: (B, Cs, S), dynamic: (B, Cd, S) float32 (PyTorch NCW layout)."""
    ws, bs, wd, bd, w1, b1, w2, b2, w3, b3 = params
    B, Cs, S = static.shape
    _, Cd, _ = dynamic.shape
    H = ws.shape[1]

    # NCW -> one channel-last 2-D slab (B*S, C): a single M=B*S problem.
    xs = jnp.transpose(static, (0, 2, 1)).reshape(B * S, Cs).astype(jnp.float32)
    xd = jnp.transpose(dynamic, (0, 2, 1)).reshape(B * S, Cd).astype(jnp.float32)

    # Fold the activation-free encoders (and their biases) into fc1.
    w1s, w1d = w1[:H, :], w1[H:, :]
    wsf = (ws @ w1s).astype(jnp.float32)                   # (Cs, 20)
    wdf = (wd @ w1d).astype(jnp.float32)                   # (Cd, 20)
    bf = (bs @ w1s + bd @ w1d + b1).astype(jnp.float32)    # (1, 20)
    w3t = jnp.transpose(w3).astype(jnp.float32)            # (1, 20)
    b3s = (b3 * jnp.float32(S)).astype(jnp.float32)        # (1, 1): bias summed over S

    tile_b = _choose_tile_b(B, S, max_tile_rows)
    grid = (B // tile_b,)
    tm = tile_b * S

    def rows_spec(c):
        return pl.BlockSpec((tm, c), lambda i: (i, 0))

    def full_spec(a):
        return pl.BlockSpec(a.shape, lambda i: (0,) * a.ndim)

    return pl.pallas_call(
        state_critic_kernel,
        out_shape=jax.ShapeDtypeStruct((B, 1), jnp.float32),
        grid=grid,
        in_specs=[rows_spec(Cs), rows_spec(Cd),
                  full_spec(wsf), full_spec(wdf), full_spec(bf),
                  full_spec(w2), full_spec(b2), full_spec(w3t), full_spec(b3s)],
        out_specs=pl.BlockSpec((tile_b, 1), lambda i: (i, 0)),
        compiler_params=pltpu.CompilerParams(
            dimension_semantics=("parallel",)),
    )(xs, xd, wsf, wdf, bf, w2, b2, w3t, b3s)


def state_critic_reference(static, dynamic, params):
    """Pure-JAX reference mirroring the original (un-folded) PyTorch forward."""
    ws, bs, wd, bd, w1, b1, w2, b2, w3, b3 = params
    xs = jnp.transpose(static, (0, 2, 1))
    xd = jnp.transpose(dynamic, (0, 2, 1))
    hs = jnp.einsum('bsc,ch->bsh', xs, ws) + bs
    hd = jnp.einsum('bsc,ch->bsh', xd, wd) + bd
    h = jnp.concatenate([hs, hd], axis=-1)
    o = jax.nn.relu(jnp.einsum('bsc,ch->bsh', h, w1) + b1)
    o = jax.nn.relu(jnp.einsum('bsc,ch->bsh', o, w2) + b2)
    o = jnp.einsum('bsc,ch->bsh', o, w3) + b3
    return jnp.sum(o, axis=1)


def _xavier_uniform(key, fan_in, fan_out):
    bound = (6.0 / (fan_in + fan_out)) ** 0.5
    return jax.random.uniform(key, (fan_in, fan_out), jnp.float32, -bound, bound)


def _bias_init(key, fan_in, fan_out):
    # PyTorch Conv1d default bias init: U(-1/sqrt(fan_in), 1/sqrt(fan_in))
    bound = 1.0 / (fan_in ** 0.5)
    return jax.random.uniform(key, (1, fan_out), jnp.float32, -bound, bound)


def make_params(key, static_size, dynamic_size, hidden_size):
    ks = jax.random.split(key, 10)
    ws = _xavier_uniform(ks[0], static_size, hidden_size)
    bs = _bias_init(ks[1], static_size, hidden_size)
    wd = _xavier_uniform(ks[2], dynamic_size, hidden_size)
    bd = _bias_init(ks[3], dynamic_size, hidden_size)
    w1 = _xavier_uniform(ks[4], hidden_size * 2, 20)
    b1 = _bias_init(ks[5], hidden_size * 2, 20)
    w2 = _xavier_uniform(ks[6], 20, 20)
    b2 = _bias_init(ks[7], 20, 20)
    w3 = _xavier_uniform(ks[8], 20, 1)
    b3 = _bias_init(ks[9], 20, 1)
    return (ws, bs, wd, bd, w1, b1, w2, b2, w3, b3)


if __name__ == "__main__":
    key = jax.random.PRNGKey(0)
    B, S = 2, 8
    static_size, dynamic_size, hidden_size = 2, 3, 32

    k_params, k_s, k_d = jax.random.split(key, 3)
    params = make_params(k_params, static_size, dynamic_size, hidden_size)

    static = jax.random.normal(k_s, (B, static_size, S), jnp.float32)
    dynamic = jax.random.normal(k_d, (B, dynamic_size, S), jnp.float32)

    out = state_critic(static, dynamic, params)
    out = jax.block_until_ready(out)

    ref = state_critic_reference(static, dynamic, params)
    assert out.shape == (B, 1)
    assert jnp.allclose(out, ref, atol=1e-3, rtol=1e-3), (out, ref)

    print("KERNEL_OK")
</pallas_src>

<mosaic_0001>
module attributes {stable_mosaic.version = 11 : i64} {
  func.func @state_critic_kernel(%arg0: i32, %arg1: memref<16x2xf32, #tpu.memory_space<vmem>>, %arg2: memref<16x3xf32, #tpu.memory_space<vmem>>, %arg3: memref<2x20xf32, #tpu.memory_space<vmem>>, %arg4: memref<3x20xf32, #tpu.memory_space<vmem>>, %arg5: memref<1x20xf32, #tpu.memory_space<vmem>>, %arg6: memref<20x20xf32, #tpu.memory_space<vmem>>, %arg7: memref<1x20xf32, #tpu.memory_space<vmem>>, %arg8: memref<1x20xf32, #tpu.memory_space<vmem>>, %arg9: memref<1x1xf32, #tpu.memory_space<vmem>>, %arg10: memref<2x1xf32, #tpu.memory_space<vmem>>) attributes {dimension_semantics = [#tpu.dimension_semantics<parallel>], iteration_bounds = array<i64: 1>, scalar_prefetch = 0 : i64, scratch_operands = 0 : i64, tpu.core_type = #tpu.core_type<tc>, window_params = [{transform_indices = @transform_0, window_bounds = array<i64: 16, 2>}, {transform_indices = @transform_1, window_bounds = array<i64: 16, 3>}, {pipeline_mode = #tpu.pipeline_mode<synchronous>, transform_indices = @transform_2, window_bounds = array<i64: 2, 20>}, {pipeline_mode = #tpu.pipeline_mode<synchronous>, transform_indices = @transform_3, window_bounds = array<i64: 3, 20>}, {pipeline_mode = #tpu.pipeline_mode<synchronous>, transform_indices = @transform_4, window_bounds = array<i64: 1, 20>}, {pipeline_mode = #tpu.pipeline_mode<synchronous>, transform_indices = @transform_5, window_bounds = array<i64: 20, 20>}, {pipeline_mode = #tpu.pipeline_mode<synchronous>, transform_indices = @transform_6, window_bounds = array<i64: 1, 20>}, {pipeline_mode = #tpu.pipeline_mode<synchronous>, transform_indices = @transform_7, window_bounds = array<i64: 1, 20>}, {pipeline_mode = #tpu.pipeline_mode<synchronous>, transform_indices = @transform_8, window_bounds = array<i64: 1, 1>}, {transform_indices = @transform_9, window_bounds = array<i64: 2, 1>}]} {
    %c0 = arith.constant 0 : index
    %c0_0 = arith.constant 0 : index
    %0 = vector.load %arg1[%c0, %c0_0] : memref<16x2xf32, #tpu.memory_space<vmem>>, vector<16x2xf32>
    %c0_1 = arith.constant 0 : index
    %c0_2 = arith.constant 0 : index
    %1 = vector.load %arg2[%c0_1, %c0_2] : memref<16x3xf32, #tpu.memory_space<vmem>>, vector<16x3xf32>
    %c0_3 = arith.constant 0 : index
    %c0_4 = arith.constant 0 : index
    %2 = vector.load %arg3[%c0_3, %c0_4] : memref<2x20xf32, #tpu.memory_space<vmem>>, vector<2x20xf32>
    %c0_5 = arith.constant 0 : index
    %c0_6 = arith.constant 0 : index
    %3 = vector.load %arg4[%c0_5, %c0_6] : memref<3x20xf32, #tpu.memory_space<vmem>>, vector<3x20xf32>
    %4 = vector.extract_strided_slice %0 {offsets = [0, 0], sizes = [16, 1], strides = [1, 1]} : vector<16x2xf32> to vector<16x1xf32>
    %5 = vector.extract_strided_slice %2 {offsets = [0, 0], sizes = [1, 20], strides = [1, 1]} : vector<2x20xf32> to vector<1x20xf32>
    %6 = vector.broadcast %4 : vector<16x1xf32> to vector<16x20xf32>
    %7 = vector.broadcast %5 : vector<1x20xf32> to vector<16x20xf32>
    %8 = arith.mulf %6, %7 : vector<16x20xf32>
    %c0_7 = arith.constant 0 : index
    %c0_8 = arith.constant 0 : index
    %9 = vector.load %arg5[%c0_7, %c0_8] : memref<1x20xf32, #tpu.memory_space<vmem>>, vector<1x20xf32>
    %10 = vector.broadcast %9 : vector<1x20xf32> to vector<16x20xf32>
    %11 = arith.addf %8, %10 : vector<16x20xf32>
    %12 = vector.extract_strided_slice %0 {offsets = [0, 1], sizes = [16, 1], strides = [1, 1]} : vector<16x2xf32> to vector<16x1xf32>
    %13 = vector.extract_strided_slice %2 {offsets = [1, 0], sizes = [1, 20], strides = [1, 1]} : vector<2x20xf32> to vector<1x20xf32>
    %14 = vector.broadcast %12 : vector<16x1xf32> to vector<16x20xf32>
    %15 = vector.broadcast %13 : vector<1x20xf32> to vector<16x20xf32>
    %16 = arith.mulf %14, %15 : vector<16x20xf32>
    %17 = arith.addf %11, %16 : vector<16x20xf32>
    %18 = vector.extract_strided_slice %1 {offsets = [0, 0], sizes = [16, 1], strides = [1, 1]} : vector<16x3xf32> to vector<16x1xf32>
    %19 = vector.extract_strided_slice %3 {offsets = [0, 0], sizes = [1, 20], strides = [1, 1]} : vector<3x20xf32> to vector<1x20xf32>
    %20 = vector.broadcast %18 : vector<16x1xf32> to vector<16x20xf32>
    %21 = vector.broadcast %19 : vector<1x20xf32> to vector<16x20xf32>
    %22 = arith.mulf %20, %21 : vector<16x20xf32>
    %23 = arith.addf %17, %22 : vector<16x20xf32>
    %24 = vector.extract_strided_slice %1 {offsets = [0, 1], sizes = [16, 1], strides = [1, 1]} : vector<16x3xf32> to vector<16x1xf32>
    %25 = vector.extract_strided_slice %3 {offsets = [1, 0], sizes = [1, 20], strides = [1, 1]} : vector<3x20xf32> to vector<1x20xf32>
    %26 = vector.broadcast %24 : vector<16x1xf32> to vector<16x20xf32>
    %27 = vector.broadcast %25 : vector<1x20xf32> to vector<16x20xf32>
    %28 = arith.mulf %26, %27 : vector<16x20xf32>
    %29 = arith.addf %23, %28 : vector<16x20xf32>
    %30 = vector.extract_strided_slice %1 {offsets = [0, 2], sizes = [16, 1], strides = [1, 1]} : vector<16x3xf32> to vector<16x1xf32>
    %31 = vector.extract_strided_slice %3 {offsets = [2, 0], sizes = [1, 20], strides = [1, 1]} : vector<3x20xf32> to vector<1x20xf32>
    %32 = vector.broadcast %30 : vector<16x1xf32> to vector<16x20xf32>
    %33 = vector.broadcast %31 : vector<1x20xf32> to vector<16x20xf32>
    %34 = arith.mulf %32, %33 : vector<16x20xf32>
    %35 = arith.addf %29, %34 : vector<16x20xf32>
    %cst = arith.constant 0.000000e+00 : f32
    %36 = vector.broadcast %cst : f32 to vector<16x20xf32>
    %37 = arith.maximumf %35, %36 : vector<16x20xf32>
    %c0_9 = arith.constant 0 : index
    %c0_10 = arith.constant 0 : index
    %38 = vector.load %arg6[%c0_9, %c0_10] : memref<20x20xf32, #tpu.memory_space<vmem>>, vector<20x20xf32>
    %cst_11 = arith.constant dense<0.000000e+00> : vector<16x20xf32>
    %39 = tpu.matmul %37, %38, %cst_11 {dimension_numbers = #tpu.dot_dimension_numbers<[1], [0], [0], [1], [0, 0, 1, 1], [], []>} : vector<16x20xf32>, vector<20x20xf32>, vector<16x20xf32> -> vector<16x20xf32>
    %c0_12 = arith.constant 0 : index
    %c0_13 = arith.constant 0 : index
    %40 = vector.load %arg7[%c0_12, %c0_13] : memref<1x20xf32, #tpu.memory_space<vmem>>, vector<1x20xf32>
    %41 = vector.broadcast %40 : vector<1x20xf32> to vector<16x20xf32>
    %42 = arith.addf %39, %41 : vector<16x20xf32>
    %cst_14 = arith.constant 0.000000e+00 : f32
    %43 = vector.broadcast %cst_14 : f32 to vector<16x20xf32>
    %44 = arith.maximumf %42, %43 : vector<16x20xf32>
    %45 = vector.shape_cast %44 : vector<16x20xf32> to vector<2x8x20xf32>
    %cst_15 = arith.constant dense<0.000000e+00> : vector<2x20xf32>
    %46 = vector.multi_reduction <add>, %45, %cst_15 [1] : vector<2x8x20xf32> to vector<2x20xf32>
    %c0_16 = arith.constant 0 : index
    %c0_17 = arith.constant 0 : index
    %47 = vector.load %arg8[%c0_16, %c0_17] : memref<1x20xf32, #tpu.memory_space<vmem>>, vector<1x20xf32>
    %48 = vector.broadcast %47 : vector<1x20xf32> to vector<2x20xf32>
    %49 = arith.mulf %46, %48 : vector<2x20xf32>
    %cst_18 = arith.constant dense<0.000000e+00> : vector<2xf32>
    %50 = vector.multi_reduction <add>, %49, %cst_18 [1] : vector<2x20xf32> to vector<2xf32>
    %51 = vector.shape_cast %50 : vector<2xf32> to vector<2x1xf32>
    %c0_19 = arith.constant 0 : index
    %c0_20 = arith.constant 0 : index
    %52 = vector.load %arg9[%c0_19, %c0_20] : memref<1x1xf32, #tpu.memory_space<vmem>>, vector<1x1xf32>
    %53 = vector.broadcast %52 : vector<1x1xf32> to vector<2x1xf32>
    %54 = arith.addf %51, %53 : vector<2x1xf32>
    %c0_21 = arith.constant 0 : index
    %c0_22 = arith.constant 0 : index
    %55 = vector.load %arg10[%c0_21, %c0_22] : memref<2x1xf32, #tpu.memory_space<vmem>>, vector<2x1xf32>
    tpu.vector_store %arg10[%c0_21, %c0_22], %54 {strides = array<i32>} : memref<2x1xf32, #tpu.memory_space<vmem>>, vector<2x1xf32>,
    return
  }
  func.func @transform_0(%arg0: i32) -> (i32, i32) {
    %c0_i32 = arith.constant 0 : i32
    %c0_i32_0 = arith.constant 0 : i32
    return %arg0, %c0_i32 : i32, i32
  }
  func.func @transform_1(%arg0: i32) -> (i32, i32) {
    %c0_i32 = arith.constant 0 : i32
    %c0_i32_0 = arith.constant 0 : i32
    return %arg0, %c0_i32 : i32, i32
  }
  func.func @transform_2(%arg0: i32) -> (i32, i32) {
    %c0_i32 = arith.constant 0 : i32
    %c0_i32_0 = arith.constant 0 : i32
    %c0_i32_1 = arith.constant 0 : i32
    return %c0_i32, %c0_i32_0 : i32, i32
  }
  func.func @transform_3(%arg0: i32) -> (i32, i32) {
    %c0_i32 = arith.constant 0 : i32
    %c0_i32_0 = arith.constant 0 : i32
    %c0_i32_1 = arith.constant 0 : i32
    return %c0_i32, %c0_i32_0 : i32, i32
  }
  func.func @transform_4(%arg0: i32) -> (i32, i32) {
    %c0_i32 = arith.constant 0 : i32
    %c0_i32_0 = arith.constant 0 : i32
    %c0_i32_1 = arith.constant 0 : i32
    return %c0_i32, %c0_i32_0 : i32, i32
  }
  func.func @transform_5(%arg0: i32) -> (i32, i32) {
    %c0_i32 = arith.constant 0 : i32
    %c0_i32_0 = arith.constant 0 : i32
    %c0_i32_1 = arith.constant 0 : i32
    return %c0_i32, %c0_i32_0 : i32, i32
  }
  func.func @transform_6(%arg0: i32) -> (i32, i32) {
    %c0_i32 = arith.constant 0 : i32
    %c0_i32_0 = arith.constant 0 : i32
    %c0_i32_1 = arith.constant 0 : i32
    return %c0_i32, %c0_i32_0 : i32, i32
  }
  func.func @transform_7(%arg0: i32) -> (i32, i32) {
    %c0_i32 = arith.constant 0 : i32
    %c0_i32_0 = arith.constant 0 : i32
    %c0_i32_1 = arith.constant 0 : i32
    return %c0_i32, %c0_i32_0 : i32, i32
  }
  func.func @transform_8(%arg0: i32) -> (i32, i32) {
    %c0_i32 = arith.constant 0 : i32
    %c0_i32_0 = arith.constant 0 : i32
    %c0_i32_1 = arith.constant 0 : i32
    return %c0_i32, %c0_i32_0 : i32, i32
  }
  func.func @transform_9(%arg0: i32) -> (i32, i32) {
    %c0_i32 = arith.constant 0 : i32
    %c0_i32_0 = arith.constant 0 : i32
    return %arg0, %c0_i32 : i32, i32
  }
}

</mosaic_0001>

<bundles_post_ra>
// kernel: tpu_custom_call.1
= control target key start
LH: loop header
LB: loop body
LE: loop exit
PB: predicated region body
PF: predicated region fallthrough
CT: control target
= control target key end

     0   :  { %v313_v0 = vmov 1   ;;  %v314_v1 = vmov 0   ;;  %v315_v6 = vmov 2   ;;  %vm150_vm0 = vcmask 1043456   ;;  %s412_s0 = inlined_call_operand.vmem [shape: f32[16,2], index: 0, kind: input, shape index: {}]   ;;  %s413_s1 = inlined_call_operand.vmem [shape: f32[16,3], index: 1, kind: input, shape index: {}]   ;;  %s414_s5 = inlined_call_operand.vmem [shape: f32[20,20], index: 5, kind: input, shape index: {}]   ;;  %s415_s2 = inlined_call_operand.vmem [shape: f32[2,20], index: 2, kind: input, shape index: {}]   ;;  %s416_s3 = inlined_call_operand.vmem [shape: f32[3,20], index: 3, kind: input, shape index: {}]   ;;  %s417_s4 = inlined_call_operand.vmem [shape: f32[1,20], index: 4, kind: input, shape index: {}]   ;;  %s418_s8 = inlined_call_operand.<no memory space> [shape: f32[1,1], index: 8, kind: input, shape index: {}]   ;;  %s419_s6 = inlined_call_operand.vmem [shape: f32[1,20], index: 6, kind: input, shape index: {}]   ;;  %s420_s7 = inlined_call_operand.vmem [shape: f32[1,20], index: 7, kind: input, shape index: {}]   ;;  %s421_s9 = inlined_call_operand.vmem [shape: f32[2,1], index: 9, kind: output, shape index: {}]  }
   0x1   :  { %307 = vset.pattern.permute.xlu1 %v313_v0  ;;  %306 = vset.pattern.permute.xlu0 %v314_v1  ;;  %v34_v2 = vld [vmem:[%s412_s0] sm:$0xff]  ;;  %v35_v3 = vld [vmem:[%s412_s0 + $0x8] sm:$0xff]  ;;  %v135_v10 = vld [vmem:[%s414_s5 + $0x10] sm:$0xf]  ;;  %v50_v11 = vlaneseq  ;;  %vm143_vm1 = vcmask 162816   ;;  %v14_v56 = vstv %s418_s8  ;;  %vm257_vm2 = vcmask 1041409  }
   0x2   :  { %66 = vperm.xlu1 %307, %v34_v2   ;;  %42 = vperm.xlu0 %306, %v34_v2   ;;  %v36_v4 = vld [vmem:[%s413_s1] sm:$0xff]  ;;  %v37_v5 = vld [vmem:[%s413_s1 + $0x8] sm:$0xff]  ;;  %15 = vst [vmem:[#allocation2] sm:$0x1] %v14_v56  ;;  %vm260_vm3 = vcmask 156672   ;;  %vm272_vm4 = vcmask 1024  }
   0x3   :  { %v133_v7 = vld [vmem:[%s414_s5] sm:$0xff]  ;;  %v134_v8 = vld [vmem:[%s414_s5 + $0x8] sm:$0xff]  ;;  %v51_v12 = vshrl.u32 %v50_v11, 7 }
   0x4   :  { %v299_v9 = vpack.c.bf16 %v134_v8, %v133_v7  ;;  %v38_v14 = vld [vmem:[%s415_s2] sm:$0x3] }
   0x5   :  { %v52_v13 = vsub.s32 0, %v51_v12  ;;  %v75_v20 = vsub.s32 1, %v51_v12  ;;  %v39_v22 = vld [vmem:[%s416_s3] sm:$0x7]  ;;  %v125_v32 = vsub.s32 2, %v51_v12 }
   0x6   :  { %70 = vperm.xlu1 %307, %v35_v3   ;;  %47 = vperm.xlu0 %306, %v35_v3   ;;  %v278_v23 = vld [vmem:[%s417_s4] ss:$0 sm:$0xff] }
   0x7   :  { %300 = vmatprep.subr.bf16.mxu0 %v299_v9  ;;  %v53_v17 = vrot.slane %v38_v14, %v52_v13  ;;  %v76_v26 = vrot.slane %v38_v14, %v75_v20  ;;  %v94_v28 = vrot.slane %v39_v22, %v52_v13  ;;  %v110_v31 = vrot.slane %v39_v22, %v75_v20  ;;  %v279_v57 = vld [vmem:[%s419_s6] ss:$0 sm:$0xff] }
   0x8   :  { %302 = vmatpush3.bf16.msra.mxu0 %v299_v9  ;;  %v126_v41 = vrot.slane %v39_v22, %v125_v32  ;;  %v283_v12 = vld [vmem:[%s420_s7] ss:$0 sm:$0xff] }
   0x9   :  { %294 = vmatprep.subr.msk.mxu0 %vm150_vm0, %v135_v10  ;;  %v284_v20 = vld [vmem:[#allocation2] ss:$0 sm:$0xff] }
   0xa   :  { %308 = vset.pattern.permute.xlu1 %v314_v1  ;;  %83 = vperm.xlu0 %306, %v36_v4  }
   0xb   :  { %88 = vperm.xlu1 %308, %v37_v5  }
   0xc   :  { %295 = vmatpush3.msk.msra.mxu0 %vm150_vm0, %v135_v10 }
   0xe   :  { %309 = vset.pattern.permute.xlu0 %v313_v0 }
   0xf   :  { %310 = vset.pattern.permute.xlu1 %v313_v0  ;;  %100 = vperm.xlu0 %309, %v36_v4  }
  0x10   :  { %104 = vperm.xlu1 %310, %v37_v5  }
  0x13   :  { %312 = vset.pattern.permute.xlu0 %v315_v6 }
  0x14   :  { %311 = vset.pattern.permute.xlu1 %v315_v6  ;;  %120 = vperm.xlu0 %312, %v37_v5  }
  0x15   :  { %116 = vperm.xlu1 %311, %v36_v4  }
  0x81   :  { %v67_v15 = vpop.permute.xlu1 %66  ;;  %v43_v16 = vpop.permute.xlu0 %42 }
  0x82   :  { %v54_v24 = vmul.f32 %v53_v17, %v43_v16  ;;  %v77_v37 = vmul.f32 %v76_v26, %v67_v15 }
  0x84   :  { %v63_v33 = vadd.f32 %v278_v23, %v54_v24 }
  0x85   :  { %v71_v18 = vpop.permute.xlu1 %70  ;;  %v48_v19 = vpop.permute.xlu0 %47 }
  0x86   :  { %v55_v21 = vmul.f32 %v53_v17, %v48_v19  ;;  %v78_v30 = vmul.f32 %v76_v26, %v71_v18  ;;  %v79_v42 = vadd.f32 %v77_v37, %v63_v33 }
  0x88   :  { %v64_v27 = vadd.f32 %v278_v23, %v55_v21 }
  0x89   :  { %v84_v25 = vpop.permute.xlu0 %83 }
  0x8a   :  { %v89_v29 = vpop.permute.xlu1 %88  ;;  %v80_v34 = vadd.f32 %v78_v30, %v64_v27  ;;  %v95_v38 = vmul.f32 %v94_v28, %v84_v25 }
  0x8b   :  { %v96_v35 = vmul.f32 %v94_v28, %v89_v29 }
  0x8c   :  { %v97_v45 = vadd.f32 %v95_v38, %v79_v42 }
  0x8d   :  { %v98_v44 = vadd.f32 %v96_v35, %v80_v34 }
  0x8e   :  { %v101_v36 = vpop.permute.xlu0 %100 }
  0x8f   :  { %v105_v39 = vpop.permute.xlu1 %104  ;;  %v111_v43 = vmul.f32 %v110_v31, %v101_v36 }
  0x90   :  { %v112_v40 = vmul.f32 %v110_v31, %v105_v39 }
  0x91   :  { %v113_v50 = vadd.f32 %v111_v43, %v97_v45 }
  0x92   :  { %v114_v47 = vadd.f32 %v112_v40, %v98_v44 }
  0x93   :  { %v121_v46 = vpop.permute.xlu0 %120 }
  0x94   :  { %v128_v48 = vmul.f32 %v126_v41, %v121_v46  ;;  %v117_v49 = vpop.permute.xlu1 %116 }
  0x95   :  { %v127_v51 = vmul.f32 %v126_v41, %v117_v49 }
  0x96   :  { %v130_v52 = vadd.f32 %v128_v48, %v114_v47 }
  0x97   :  { %v129_v53 = vadd.f32 %v127_v51, %v113_v50 }
  0x98   :  { %v132_v55 = vmax.f32 %v130_v52, 0.0 }
  0x99   :  { %v131_v54 = vmax.f32 %v129_v53, 0.0 }
  0x9b   :  { %296 = vmatprep.mubr.msk.f32.mxu0 %vm143_vm1, %v131_v54 }
  0x9c   :  { %297 = vmatmul.mubr.msk.f32.vlgmr.msra.gmra.mrb[0].mxu0 %vm143_vm1, %v132_v55 }
 0x16f   :  { %v298_v58 = vpop.f32.mrb[0].mxu0 }
 0x170   :  { %v226_v59 = vadd.f32 %v298_v58, %v279_v57  ;;  %v220_v60 = vpop.f32.mrb[1].mxu0 }
 0x171   :  { %v221_v61 = vadd.f32 %v279_v57, %v220_v60 }
 0x172   :  { %v230_v62 = vmax.f32 %v226_v59, 0.0 }
 0x173   :  { %v229_v63 = vmax.f32 %v221_v61, 0.0 }
 0x174   :  { %v238_v0 = vsel %vm143_vm1, %v230_v62, 0.0 }
 0x175   :  { %v239_v1 = vrot.slane %v238_v0, 4  ;;  %v231_v2 = vsel %vm143_vm1, %v229_v63, 0.0 }
 0x176   :  { %v232_v3 = vrot.slane %v231_v2, 4 }
 0x177   :  { %v240_v4 = vadd.f32 %v239_v1, %v238_v0 }
 0x178   :  { %v233_v5 = vadd.f32 %v232_v3, %v231_v2 }
 0x179   :  { %v241_v6 = vrot.slane %v240_v4, 2 }
 0x17a   :  { %v234_v7 = vrot.slane %v233_v5, 2 }
 0x17b   :  { %v242_v8 = vadd.f32 %v241_v6, %v240_v4 }
 0x17c   :  { %v235_v9 = vadd.f32 %v234_v7, %v233_v5 }
 0x17d   :  { %v243_v10 = vrot.slane %v242_v8, 1 }
 0x17e   :  { %v236_v11 = vrot.slane %v235_v9, 1 }
 0x17f   :  { %v244_v13 = vadd.f32 %v243_v10, %v242_v8 }
 0x180   :  { %v237_v14 = vadd.f32 %v236_v11, %v235_v9 }
 0x181   :  { %v253_v15 = vmul.f32 %v283_v12, %v244_v13 }
 0x182   :  { %v252_v16 = vmul.f32 %v283_v12, %v237_v14 }
 0x183   :  { %v256_v17 = vrot.slane %v253_v15, 7 }
 0x185   :  { %v258_v18 = vsel %vm257_vm2, %v256_v17, %v252_v16 }
 0x186   :  { %v261_v19 = vsel %vm260_vm3, %v258_v18, 0.0 }
 0x187   :  { %262 = vadd.xlane.f32.xlu1 %v261_v19 }
 0x214   :  { %v263_v21 = vpop.xlane.xlu1 %262 }
 0x215   :  { %v271_v22 = vadd.f32 %v284_v20, %v263_v21 }
 0x217   :  { %273 = vst.msk [vmem:[%s421_s9] sm:$0x3] %vm272_vm4, %v271_v22 }

</bundles_post_ra>
